<compile_context>
chip_gen: v7x
topology: tpu7x:2x2x1
jax: 0.10.0
libtpu: 0.0.40
codegen_flags: <defaults>
</compile_context>

<pallas_src>
import functools

import jax
import jax.numpy as jnp
from jax.experimental import pallas as pl
from jax.experimental.pallas import tpu as pltpu


def _pairwise_ranking_partial_kernel(scores_ref, out_ref, *, margin, batch,
                                     block_b, need_row_mask):
    """Writes this tile's partial hinge-loss sum to out_ref[0, 0].

    partial = sum_{rows, ALL cols} max(margin - (pos - s), 0)
              - n_valid_rows * max(margin, 0)
    which equals the reference sum over negative columns only, because
    column 0's term is exactly max(margin, 0) for every row.
    """
    s = scores_ref[...].astype(jnp.float32)          # (TB, C)
    pos = s[:, 0:1]                                  # (TB, 1) positive scores
    hinge = jnp.maximum(margin - (pos - s), 0.0)     # over all columns

    margin_pos = max(float(margin), 0.0)             # compile-time constant

    if need_row_mask:
        # Last tile may extend past the real batch: zero padded rows.
        i = pl.program_id(0)
        remaining = batch - i * block_b              # traced int32 scalar
        row = jax.lax.broadcasted_iota(jnp.int32, s.shape, 0)
        hinge = jnp.where(row < remaining, hinge, 0.0)
        n_valid = jnp.minimum(remaining, block_b).astype(jnp.float32)
        correction = n_valid * margin_pos
    else:
        correction = float(block_b) * margin_pos

    out_ref[0, 0] = jnp.sum(hinge) - correction


def pairwise_ranking_loss(scores, labels=None, alpha=1.0, margin=1.0,
                          block_b=None):
    """Pallas implementation of PairwiseRankingLoss.forward.

    `labels` is accepted for API parity with the PyTorch module but is never
    read by the forward pass, so it is dropped before pallas_call (no DMA).
    """
    del labels  # unused by the reference forward pass
    b, c = scores.shape
    if c < 2:
        raise ValueError("candidate_num must be >= 2 (division by c - 1).")

    itemsize = scores.dtype.itemsize
    sub = 16 if itemsize == 2 else 8                 # sublane multiple (bf16/f32)

    if block_b is None:
        if b <= sub:
            block_b = b                              # single full-extent block
        else:
            # Target ~2 MiB per in-flight block (x2 double buffering ~4 MiB):
            # comfortable on v5e (16 MiB scoped), v6e (32 MiB) and v7x (32 MiB).
            target_bytes = 2 << 20
            tb = max(sub, (target_bytes // max(1, c * itemsize)) // sub * sub)
            block_b = min(tb, (b // sub) * sub)

    num_tiles = pl.cdiv(b, block_b)
    need_row_mask = (b % block_b) != 0

    kernel = functools.partial(
        _pairwise_ranking_partial_kernel,
        margin=float(margin),
        batch=b,
        block_b=block_b,
        need_row_mask=need_row_mask,
    )

    block_bytes = block_b * c * itemsize
    vmem_limit = min(64 << 20, max(4 * block_bytes + (4 << 20), 16 << 20))

    partials = pl.pallas_call(
        kernel,
        out_shape=jax.ShapeDtypeStruct((num_tiles, 1), jnp.float32),
        grid_spec=pltpu.PrefetchScalarGridSpec(
            num_scalar_prefetch=0,
            grid=(num_tiles,),
            in_specs=[pl.BlockSpec((block_b, c), lambda i: (i, 0))],
            out_specs=pl.BlockSpec((1, 1), lambda i: (i, 0),
                                   memory_space=pltpu.SMEM),
        ),
        compiler_params=pltpu.CompilerParams(
            dimension_semantics=("parallel",),
            vmem_limit_bytes=int(vmem_limit),
        ),
    )(scores)

    # Fold alpha / (b * (c - 1)) into one precomputed scalar multiplier.
    scale = float(alpha) / (b * (c - 1))
    return jnp.sum(partials) * scale


def _reference(scores, alpha=1.0, margin=1.0):
    pos = scores[:, 0:1].astype(jnp.float32)
    neg = scores[:, 1:].astype(jnp.float32)
    ranking_loss = jnp.sum(jnp.maximum(margin - (pos - neg), 0.0))
    return alpha * ranking_loss / (scores.shape[0] * (scores.shape[1] - 1))


if __name__ == "__main__":
    key = jax.random.PRNGKey(0)
    k1, k2, k3 = jax.random.split(key, 3)

    # 1) Small case matching the module's expected shapes (batch=2, cand=8).
    batch, cand = 2, 8
    scores = jax.random.normal(k1, (batch, cand), dtype=jnp.float32)
    labels = jnp.concatenate(
        [jnp.ones((batch, 1), jnp.float32),
         jnp.zeros((batch, cand - 1), jnp.float32)], axis=1)
    loss = pairwise_ranking_loss(scores, labels, alpha=1.0, margin=1.0)
    jax.block_until_ready(loss)
    ref = _reference(scores, alpha=1.0, margin=1.0)
    assert jnp.allclose(loss, ref, atol=1e-5, rtol=1e-5), (loss, ref)

    # 2) Multi-tile path (evenly divisible batch).
    scores2 = jax.random.normal(k2, (24, 8), dtype=jnp.float32)
    loss2 = pairwise_ranking_loss(scores2, None, alpha=0.5, margin=1.0,
                                  block_b=8)
    jax.block_until_ready(loss2)
    ref2 = _reference(scores2, alpha=0.5, margin=1.0)
    assert jnp.allclose(loss2, ref2, atol=1e-5, rtol=1e-5), (loss2, ref2)

    # 3) Ragged last tile (row mask + valid-row correction path).
    scores3 = jax.random.normal(k3, (20, 8), dtype=jnp.float32)
    loss3 = pairwise_ranking_loss(scores3, None, alpha=1.0, margin=0.5,
                                  block_b=8)
    jax.block_until_ready(loss3)
    ref3 = _reference(scores3, alpha=1.0, margin=0.5)
    assert jnp.allclose(loss3, ref3, atol=1e-5, rtol=1e-5), (loss3, ref3)

    print("KERNEL_OK")
</pallas_src>

<mosaic_0001>
module attributes {stable_mosaic.version = 11 : i64} {
  func.func @_pairwise_ranking_partial_kernel(%arg0: i32, %arg1: memref<2x8xf32, #tpu.memory_space<vmem>>, %arg2: memref<1x1xf32, #tpu.memory_space<smem>>) attributes {dimension_semantics = [#tpu.dimension_semantics<parallel>], iteration_bounds = array<i64: 1>, scalar_prefetch = 0 : i64, scratch_operands = 0 : i64, tpu.core_type = #tpu.core_type<tc>, window_params = [{transform_indices = @transform_0, window_bounds = array<i64: 2, 8>}, {transform_indices = @transform_1, window_bounds = array<i64: 1, 1>}]} {
    %c0 = arith.constant 0 : index
    %c0_0 = arith.constant 0 : index
    %0 = vector.load %arg1[%c0, %c0_0] : memref<2x8xf32, #tpu.memory_space<vmem>>, vector<2x8xf32>
    %1 = vector.extract_strided_slice %0 {offsets = [0, 0], sizes = [2, 1], strides = [1, 1]} : vector<2x8xf32> to vector<2x1xf32>
    %2 = vector.broadcast %1 : vector<2x1xf32> to vector<2x8xf32>
    %3 = arith.subf %2, %0 : vector<2x8xf32>
    %cst = arith.constant 1.000000e+00 : f32
    %4 = vector.broadcast %cst : f32 to vector<2x8xf32>
    %5 = arith.subf %4, %3 : vector<2x8xf32>
    %cst_1 = arith.constant 0.000000e+00 : f32
    %6 = vector.broadcast %cst_1 : f32 to vector<2x8xf32>
    %7 = arith.maximumf %5, %6 : vector<2x8xf32>
    %8 = vector.shape_cast %7 : vector<2x8xf32> to vector<1x2x8xf32>
    %cst_2 = arith.constant dense<0.000000e+00> : vector<1xf32>
    %9 = vector.multi_reduction <add>, %8, %cst_2 [1, 2] : vector<1x2x8xf32> to vector<1xf32>
    %10 = vector.shape_cast %9 : vector<1xf32> to vector<1x1x1xf32>
    %11 = vector.extract %10[0, 0, 0] : f32 from vector<1x1x1xf32>
    %cst_3 = arith.constant 2.000000e+00 : f32
    %12 = arith.subf %11, %cst_3 : f32
    %c0_4 = arith.constant 0 : index
    %c0_5 = arith.constant 0 : index
    %13 = memref.load %arg2[%c0_4, %c0_5] : memref<1x1xf32, #tpu.memory_space<smem>>
    memref.store %12, %arg2[%c0_4, %c0_5] : memref<1x1xf32, #tpu.memory_space<smem>>
    return
  }
  func.func @transform_0(%arg0: i32) -> (i32, i32) {
    %c0_i32 = arith.constant 0 : i32
    %c0_i32_0 = arith.constant 0 : i32
    return %arg0, %c0_i32 : i32, i32
  }
  func.func @transform_1(%arg0: i32) -> (i32, i32) {
    %c0_i32 = arith.constant 0 : i32
    %c0_i32_0 = arith.constant 0 : i32
    return %arg0, %c0_i32 : i32, i32
  }
}

</mosaic_0001>

<bundles_post_ra>
// kernel: tpu_custom_call.1
= control target key start
LH: loop header
LB: loop body
LE: loop exit
PB: predicated region body
PF: predicated region fallthrough
CT: control target
= control target key end

     0   :  { %6 = vsyncpa [#allocation3], 0  ;;  %s138_s0 = inlined_call_operand.hbm [shape: f32[2,8], index: 0, kind: input, shape index: {}]   ;;  %s139_s1 = inlined_call_operand.hbm [shape: f32[1,1], index: 1, kind: output, shape index: {}]  }
   0x1   :  { %7 = vsyncpa [#allocation4], 0  ;;  %s101_s6 = smov [#allocation2]   ;;  %s65_s10 = scalar_lea.hbm %s138_s0, 32 }
   0x2   :  { %s14_s7 = sshll.u32 %s101_s6, 4  ;;  %p66_p0 = scmp.ne.s32.totalorder %s138_s0, %s65_s10  ;;  %s15_s7 = int_to_ptr.vmem [resolvable:$true] %s14_s7 }
   0x3   :  { %p69_p1 = scmp.lt.u32.totalorder %s65_s10, %s138_s0 }
   0x5   :  { %p71_p2 = pnand %p69_p1, %p66_p0 }
   0x7   :  { %74 = shalt.err (!%p71_p2)
}
   0x8   :  { %s75_s15 = scalar_lea.vmem %s15_s7, 32  ;;  %p80_p4 = scmp.lt.s32.totalorder %s15_s7, %s15_s7 }
   0x9   :  { %p76_p3 = scmp.ne.s32.totalorder %s15_s7, %s75_s15  ;;  %p81_p5 = scmp.lt.s32.totalorder %s75_s15, %s75_s15 }
   0xb   :  { %p82_p6 = por %p81_p5, %p80_p4 }
   0xd   :  { %p83_p7 = pnand %p82_p6, %p76_p3 }
   0xf   :  { %86 = shalt.err (!%p83_p7)
}
  0x10   :  { %17 = dma.hbm_to_vmem [thread:$0]  %s138_s0, 32, %s15_s7, [#allocation3]  }
  0x11   :  { %97 = dma.done.wait [#allocation3], 32  }
  0x12   :  { %98 = vsyncadd [#allocation3], 4294967264  ;;  %v102_v0 = vmov 0   ;;  %v21_v1 = vld [vmem:[#allocation2] sm:$0x3]  ;;  %vm30_vm0 = vcmask 58368  }
  0x13   :  { %64 = vset.pattern.permute.xlu0 %v102_v0  ;;  %s87_s21 = scalar_lea.hbm %s139_s1, 16 }
  0x14   :  { %24 = vperm.xlu0 %64, %v21_v1   ;;  %p88_p8 = scmp.ne.s32.totalorder %s139_s1, %s87_s21  ;;  %p91_p9 = scmp.lt.u32.totalorder %s87_s21, %s139_s1 }
  0x16   :  { %p93_p10 = pnand %p91_p9, %p88_p8 }
  0x93   :  { %v25_v2 = vpop.permute.xlu0 %24 }
  0x94   :  { %v27_v3 = vsub.f32 %v25_v2, %v21_v1 }
  0x96   :  { %v28_v4 = vsub.f32 1.0, %v27_v3 }
  0x98   :  { %v29_v5 = vmax.f32 %v28_v4, 0.0 }
  0x9a   :  { %v31_v6 = vsel %vm30_vm0, %v29_v5, 0.0 }
  0x9b   :  { %32 = vadd.xlane.f32.xlu0 %v31_v6 }
 0x128   :  { %v33_v7 = vpop.xlane.xlu0 %32 }
 0x129   :  { %v34_v8 = vrot.slane %v33_v7, 4 }
 0x12b   :  { %v35_v9 = vadd.f32 %v34_v8, %v33_v7 }
 0x12d   :  { %v36_v10 = vrot.slane %v35_v9, 2 }
 0x12f   :  { %v37_v11 = vadd.f32 %v36_v10, %v35_v9 }
 0x131   :  { %v38_v12 = vrot.slane %v37_v11, 1 }
 0x133   :  { %v39_v13 = vadd.f32 %v38_v12, %v37_v11 }
 0x135   :  { %59 = vpush %v39_v13 }
 0x166   :  { %s60_s0 = spop %59 }
 0x167   :  { %s58_s18 = sadd.f32 -2.0, %s60_s0 }
 0x169   :  { %43 = sst [smem:[#allocation5]] %s58_s18 }
 0x16a   :  { %96 = shalt.err (!%p93_p10)
}
 0x16b   :  { %s103_s26 = smov [#allocation5]  }
 0x16c   :  { %51 = dma.smem_to_hbm %s103_s26, 16, %s139_s1, [#allocation4]  }
 0x16d   :  { %99 = dma.done.wait [#allocation4], 16  }
 0x16e   :  { %100 = vsyncadd [#allocation4], 4294967280 }
 0x16f   :  { %55 = sfence }
 0x170   :  { %56 = vsyncpa [#allocation3], 1 }
 0x171   :  { %57 = vsyncpa [#allocation4], 1 }

</bundles_post_ra>
